<compile_context>
chip_gen: v6e
topology: v6e:2x2x1
jax: 0.10.0
libtpu: 0.0.40
codegen_flags: <defaults>
</compile_context>

<pallas_src>
import functools

import jax
import jax.numpy as jnp
from jax.experimental import pallas as pl
from jax.experimental.pallas import tpu as pltpu


def _cbn_kernel(x_ref, w_ref, b_ref, rm_ref, rv_ref,
                o_ref, new_rm_ref, new_rv_ref,
                sum_ref, sumsq_ref, scale_ref, shift_ref, xcache_ref,
                *, eps, momentum, m_count, hw, t_hw, num_t, resident):
    """Grid = (channel_group, phase, n, hw_tile), all per-group work self-contained.

    phase 0: stream tiles, accumulate per-channel sum / sum-of-squares of
             (x - running_mean) into f32 VMEM accumulators; on the last phase-0
             step compute mu, var, fused scale/shift and new running stats.
             If `resident`, also stash raw tiles in a persistent VMEM cache.
    phase 1: write y = x*scale + shift for every tile.
    """
    phase = pl.program_id(1)
    ni = pl.program_id(2)
    ti = pl.program_id(3)
    last_n = pl.num_programs(2) - 1
    last_t = pl.num_programs(3) - 1
    has_tail = (hw % t_hw) != 0          # static: last hw tile is partial
    use_wide_acc = (t_hw % 128) == 0     # static

    @pl.when(phase == 0)
    def _stats_phase():
        @pl.when(jnp.logical_and(ni == 0, ti == 0))
        def _init():
            sum_ref[...] = jnp.zeros_like(sum_ref)
            sumsq_ref[...] = jnp.zeros_like(sumsq_ref)

        x_raw = x_ref[...]                               # (C_g, T), input dtype
        if resident:
            xcache_ref[ni * num_t + ti] = x_raw          # keep for phase 1

        # f32 accumulation, centred on running_mean (c0) to avoid catastrophic
        # cancellation of E[x^2]-E[x]^2 when |mean| >> std and N*H*W is large.
        xc = x_raw.astype(jnp.float32) - rm_ref[...]
        if has_tail:
            lane = jax.lax.broadcasted_iota(jnp.int32, xc.shape, 1)
            valid = (ti * t_hw + lane) < hw
            xc = jnp.where(valid, xc, 0.0)               # edge lanes are undefined

        if use_wide_acc:
            # (C_g,128) accumulators: pure VPU adds per 128-lane group; the
            # single cross-lane (XLU) reduce is deferred to _finalize.
            s = sum_ref[...]
            s2 = sumsq_ref[...]
            for j in range(t_hw // 128):
                blk = xc[:, j * 128:(j + 1) * 128]
                s = s + blk
                s2 = s2 + blk * blk
            sum_ref[...] = s
            sumsq_ref[...] = s2
        else:
            sum_ref[...] += jnp.sum(xc, axis=1, keepdims=True)
            sumsq_ref[...] += jnp.sum(xc * xc, axis=1, keepdims=True)

        # Phase-0 -> phase-1 transition: finalize per-channel stats once.
        @pl.when(jnp.logical_and(ni == last_n, ti == last_t))
        def _finalize():
            m = jnp.float32(m_count)
            tot = jnp.sum(sum_ref[...], axis=1, keepdims=True)       # (C_g, 1)
            totsq = jnp.sum(sumsq_ref[...], axis=1, keepdims=True)
            d = tot / m                                  # mean(x - c0)
            mu = rm_ref[...] + d
            # torch.var(dim=1) default is unbiased: divide by (m - 1).
            # m == 1 gives NaN (matches torch). Clamp tiny negative rounding.
            sigma2 = jnp.maximum((totsq - m * d * d) / (m - 1.0), 0.0)
            # CBNModule out_p=False: denominator is (sqrt(var) + eps),
            # NOT sqrt(var + eps).  Intentional.
            inv = pl.reciprocal(jnp.sqrt(sigma2) + eps, approx=False)
            scale = w_ref[...] * inv
            scale_ref[...] = scale
            shift_ref[...] = b_ref[...] - mu * scale
            # Running-stat buffer updates (training & track_running_stats=True).
            new_rm_ref[...] = (1.0 - momentum) * rm_ref[...] + momentum * mu
            new_rv_ref[...] = (1.0 - momentum) * rv_ref[...] + momentum * sigma2

    @pl.when(phase == 1)
    def _normalize_phase():
        # TODO(synk): on v6e/v7x a native-bf16 phase-1 path (bf16 scale/shift,
        # no f32 upcast) would halve VPU work; kept f32 so the same kernel is
        # exact on v5e (no bf16 VALU) and for f32 inputs.
        if resident:
            xb = xcache_ref[ni * num_t + ti].astype(jnp.float32)
        else:
            xb = x_ref[...].astype(jnp.float32)
        o_ref[...] = (xb * scale_ref[...] + shift_ref[...]).astype(o_ref.dtype)


def cbn_forward(x, weight, bias, running_mean, running_var,
                eps=1e-5, momentum=0.1,
                lane_tile_cap=None, allow_resident=True, allow_channel_split=True):
    """x: (N, C, H, W). Returns (out NCHW, new_running_mean, new_running_var)."""
    n, c, h, w = x.shape
    hw = h * w
    m_count = n * hw
    x3 = x.reshape(n, c, hw)             # free reshape — no transpose, no HBM pass
    itemsize = jnp.dtype(x.dtype).itemsize

    # ---- chip-aware VMEM budget (v7x: 64 MiB/TC, v5e/v6e: 128 MiB) ----
    try:
        vmem_cap = int(pltpu.get_tpu_info().vmem_capacity_bytes)
    except Exception:
        vmem_cap = 64 * 1024 * 1024       # conservative (v7x-sized) fallback
    vmem_cap = min(max(vmem_cap, 32 * 1024 * 1024), 128 * 1024 * 1024)
    vmem_budget = (vmem_cap * 3) // 4     # leave headroom for Mosaic internals

    # ---- channel-group split: leading "parallel" grid axis feeds both TCs on
    #      v7x; harmless (sequential) on single-TC v5e/v6e.  Per-group stats
    #      need no cross-core reduce.
    num_groups = 2 if (allow_channel_split and c % 16 == 0) else 1
    c_g = c // num_groups

    # ---- lane tile from the VMEM byte budget (real input itemsize) ----
    sub = max(c_g, 8)                     # sublane footprint after padding
    bytes_per_lane = sub * itemsize
    # 4 pipeline buffers (x + out, each double-buffered) within ~1/3 of budget.
    lane_budget = (vmem_budget // 3) // (4 * bytes_per_lane)
    t_hw_cap = max(256, min(32768, (lane_budget // 128) * 128))
    if lane_tile_cap is not None:
        t_hw_cap = min(t_hw_cap, max(128, (int(lane_tile_cap) // 128) * 128))
    if hw <= t_hw_cap:
        t_hw, num_t = hw, 1               # full-dim block (no (8,128) constraint)
    else:
        t_hw = t_hw_cap
        num_t = -(-hw // t_hw)            # ceil; last tile is a masked edge block

    # ---- single-HBM-read mode: x tiles stay resident in VMEM across phases ----
    cache_bytes = n * num_t * sub * t_hw * itemsize
    stream_bytes = 4 * sub * t_hw * itemsize
    resident = bool(allow_resident and
                    cache_bytes + stream_bytes + (4 << 20) <= vmem_budget)

    w2 = weight.reshape(c, 1).astype(jnp.float32)
    b2 = bias.reshape(c, 1).astype(jnp.float32)
    rm2 = running_mean.reshape(c, 1).astype(jnp.float32)
    rv2 = running_var.reshape(c, 1).astype(jnp.float32)

    kernel = functools.partial(_cbn_kernel, eps=eps, momentum=momentum,
                               m_count=m_count, hw=hw, t_hw=t_hw, num_t=num_t,
                               resident=resident)

    last_n, last_t = n - 1, num_t - 1
    if resident:
        # Phase 1 pins x to the last phase-0 block -> no second HBM read of x.
        def x_map(g, p, ni, ti):
            keep = 1 - p
            return (ni * keep + last_n * p, g, ti * keep + last_t * p)
    else:
        def x_map(g, p, ni, ti):
            return (ni, g, ti)
    x_spec = pl.BlockSpec((None, c_g, t_hw), x_map)
    # Every phase-0 step maps the output to block (0, g, 0): the buffer is never
    # flushed until phase 1 (whose first step is the same block) writes it, so
    # no garbage tiles ever reach HBM; phase 1 writes every block exactly once.
    out_spec = pl.BlockSpec((None, c_g, t_hw),
                            lambda g, p, ni, ti: (ni * p, g, ti * p))
    # Small per-channel params stay resident per channel group.
    par_spec = pl.BlockSpec((c_g, 1), lambda g, p, ni, ti: (g, 0))

    acc_w = 128 if t_hw % 128 == 0 else 1
    scratch = [
        pltpu.VMEM((c_g, acc_w), jnp.float32),        # sum accumulator
        pltpu.VMEM((c_g, acc_w), jnp.float32),        # sum-of-squares accumulator
        pltpu.VMEM((c_g, 1), jnp.float32),            # fused scale
        pltpu.VMEM((c_g, 1), jnp.float32),            # fused shift
        pltpu.VMEM((n * num_t, c_g, t_hw), x.dtype) if resident
        else pltpu.VMEM((1, 8, 128), x.dtype),        # dummy when streaming
    ]

    passes = 2 if resident else 3
    cost = pl.CostEstimate(
        flops=7 * n * c * hw,
        transcendentals=2 * c,
        bytes_accessed=passes * n * c * hw * itemsize,
    )

    out3, new_rm, new_rv = pl.pallas_call(
        kernel,
        grid=(num_groups, 2, n, num_t),
        in_specs=[x_spec, par_spec, par_spec, par_spec, par_spec],
        out_specs=(out_spec, par_spec, par_spec),
        out_shape=(
            jax.ShapeDtypeStruct((n, c, hw), x.dtype),
            jax.ShapeDtypeStruct((c, 1), jnp.float32),
            jax.ShapeDtypeStruct((c, 1), jnp.float32),
        ),
        scratch_shapes=scratch,
        compiler_params=pltpu.CompilerParams(
            dimension_semantics=("parallel", "arbitrary", "arbitrary", "arbitrary"),
            vmem_limit_bytes=int(vmem_budget)),
        cost_estimate=cost,
    )(x3, w2, b2, rm2, rv2)

    return out3.reshape(n, c, h, w), new_rm.reshape(c), new_rv.reshape(c)


def _reference(x, weight, bias, running_mean, running_var, eps=1e-5, momentum=0.1):
    n, c, h, w = x.shape
    y = jnp.transpose(x, (1, 0, 2, 3)).reshape(c, -1).astype(jnp.float32)
    mu = y.mean(axis=1)
    sigma2 = y.var(axis=1, ddof=1)
    yn = (y - mu[:, None]) / (jnp.sqrt(sigma2)[:, None] + eps)
    yn = weight[:, None].astype(jnp.float32) * yn + bias[:, None].astype(jnp.float32)
    out = jnp.transpose(yn.reshape(c, n, h, w), (1, 0, 2, 3)).astype(x.dtype)
    new_rm = (1 - momentum) * running_mean + momentum * mu
    new_rv = (1 - momentum) * running_var + momentum * sigma2
    return out, new_rm, new_rv


def _run_case(key, shape, **kw):
    n, c, h, w = shape
    kx, kp = jax.random.split(key)
    x = jax.random.normal(kx, shape, dtype=jnp.float32) * 2.0 + 0.5
    # CBNModule.reset_parameters(): weight ~ U(0,1), bias = 0,
    # running_mean = 0, running_var = 1.
    weight = jax.random.uniform(kp, (c,), dtype=jnp.float32)
    bias = jnp.zeros((c,), jnp.float32)
    rm = jnp.zeros((c,), jnp.float32)
    rv = jnp.ones((c,), jnp.float32)

    out, nrm, nrv = cbn_forward(x, weight, bias, rm, rv, **kw)
    jax.block_until_ready((out, nrm, nrv))

    rout, rrm, rrv = _reference(x, weight, bias, rm, rv)
    assert out.shape == shape
    assert jnp.allclose(out, rout, atol=1e-4, rtol=1e-4), "output mismatch"
    assert jnp.allclose(nrm, rrm, atol=1e-5, rtol=1e-5), "running_mean mismatch"
    assert jnp.allclose(nrv, rrv, atol=1e-5, rtol=1e-5), "running_var mismatch"


if __name__ == "__main__":
    key = jax.random.PRNGKey(0)
    k1, k2, k3, k4 = jax.random.split(key, 4)
    # Default small config: single channel group, resident cache, HW % 128 == 0.
    _run_case(k1, (2, 4, 16, 16))
    # Channel split (2 groups), multi-tile HW with masked edge tile, resident.
    _run_case(k2, (2, 32, 20, 20), lane_tile_cap=256)
    # Same shapes, streaming (non-resident) phase-1 path.
    _run_case(k3, (2, 32, 20, 20), lane_tile_cap=256, allow_resident=False)
    # Single full-dim tile whose width is not a multiple of 128 (narrow acc path).
    _run_case(k4, (2, 4, 20, 20), allow_channel_split=False)

    # TODO(synk): the buffer_num>0 training branch uses torch.autograd.grad w.r.t.
    # an external conv weight and Python-side state lists; it has no clean
    # in-kernel equivalent and is not exercised by the default config
    # (buffer_num=0, burnin=0).
    print("KERNEL_OK")
</pallas_src>

<mosaic_0001>
module attributes {stable_mosaic.version = 11 : i64} {
  func.func @_cbn_kernel(%arg0: i32, %arg1: i32, %arg2: i32, %arg3: i32, %arg4: memref<1x4x256xf32, #tpu.memory_space<vmem>>, %arg5: memref<4x1xf32, #tpu.memory_space<vmem>>, %arg6: memref<4x1xf32, #tpu.memory_space<vmem>>, %arg7: memref<4x1xf32, #tpu.memory_space<vmem>>, %arg8: memref<4x1xf32, #tpu.memory_space<vmem>>, %arg9: memref<1x4x256xf32, #tpu.memory_space<vmem>>, %arg10: memref<4x1xf32, #tpu.memory_space<vmem>>, %arg11: memref<4x1xf32, #tpu.memory_space<vmem>>, %arg12: memref<4x128xf32, #tpu.memory_space<vmem>>, %arg13: memref<4x128xf32, #tpu.memory_space<vmem>>, %arg14: memref<4x1xf32, #tpu.memory_space<vmem>>, %arg15: memref<4x1xf32, #tpu.memory_space<vmem>>, %arg16: memref<2x4x256xf32, #tpu.memory_space<vmem>>) attributes {dimension_semantics = [#tpu.dimension_semantics<parallel>, #tpu.dimension_semantics<arbitrary>, #tpu.dimension_semantics<arbitrary>, #tpu.dimension_semantics<arbitrary>], iteration_bounds = array<i64: 1, 2, 2, 1>, scalar_prefetch = 0 : i64, scratch_operands = 5 : i64, tpu.core_type = #tpu.core_type<tc>, window_params = [{transform_indices = @transform_0, window_bounds = array<i64: 1, 4, 256>}, {transform_indices = @transform_1, window_bounds = array<i64: 4, 1>}, {transform_indices = @transform_2, window_bounds = array<i64: 4, 1>}, {transform_indices = @transform_3, window_bounds = array<i64: 4, 1>}, {transform_indices = @transform_4, window_bounds = array<i64: 4, 1>}, {transform_indices = @transform_5, window_bounds = array<i64: 1, 4, 256>}, {transform_indices = @transform_6, window_bounds = array<i64: 4, 1>}, {transform_indices = @transform_7, window_bounds = array<i64: 4, 1>}]} {
    %c0_i32 = arith.constant 0 : i32
    %0 = arith.cmpi eq, %arg1, %c0_i32 : i32
    %1 = arith.extui %0 : i1 to i32
    %c0_i32_0 = arith.constant 0 : i32
    %2 = arith.cmpi ne, %1, %c0_i32_0 : i32
    scf.if %2 {
      %c0_i32_2 = arith.constant 0 : i32
      %6 = arith.cmpi eq, %arg2, %c0_i32_2 : i32
      %c0_i32_3 = arith.constant 0 : i32
      %7 = arith.cmpi eq, %arg3, %c0_i32_3 : i32
      %8 = arith.andi %6, %7 : i1
      %9 = arith.extui %8 : i1 to i32
      %c0_i32_4 = arith.constant 0 : i32
      %10 = arith.cmpi ne, %9, %c0_i32_4 : i32
      scf.if %10 {
        %cst = arith.constant 0.000000e+00 : f32
        %39 = vector.broadcast %cst : f32 to vector<4x128xf32>
        %c0_23 = arith.constant 0 : index
        %c0_24 = arith.constant 0 : index
        %40 = vector.load %arg12[%c0_23, %c0_24] : memref<4x128xf32, #tpu.memory_space<vmem>>, vector<4x128xf32>
        tpu.vector_store %arg12[%c0_23, %c0_24], %39 {strides = array<i32>} : memref<4x128xf32, #tpu.memory_space<vmem>>, vector<4x128xf32>,
        %cst_25 = arith.constant 0.000000e+00 : f32
        %41 = vector.broadcast %cst_25 : f32 to vector<4x128xf32>
        %c0_26 = arith.constant 0 : index
        %c0_27 = arith.constant 0 : index
        %42 = vector.load %arg13[%c0_26, %c0_27] : memref<4x128xf32, #tpu.memory_space<vmem>>, vector<4x128xf32>
        tpu.vector_store %arg13[%c0_26, %c0_27], %41 {strides = array<i32>} : memref<4x128xf32, #tpu.memory_space<vmem>>, vector<4x128xf32>,
      } else {
      }
      %c0 = arith.constant 0 : index
      %c0_5 = arith.constant 0 : index
      %c0_6 = arith.constant 0 : index
      %11 = vector.load %arg4[%c0, %c0_5, %c0_6] : memref<1x4x256xf32, #tpu.memory_space<vmem>>, vector<1x4x256xf32>
      %12 = vector.shape_cast %11 : vector<1x4x256xf32> to vector<4x256xf32>
      %c1_i32_7 = arith.constant 1 : i32
      %13 = arith.muli %arg2, %c1_i32_7 : i32
      %14 = arith.addi %13, %arg3 : i32
      %15 = arith.index_cast %14 : i32 to index
      %c0_8 = arith.constant 0 : index
      %c0_9 = arith.constant 0 : index
      %16 = vector.load %arg16[%15, %c0_8, %c0_9] : memref<2x4x256xf32, #tpu.memory_space<vmem>>, vector<1x4x256xf32>
      %17 = vector.shape_cast %16 : vector<1x4x256xf32> to vector<4x256xf32>
      %18 = vector.shape_cast %12 : vector<4x256xf32> to vector<1x4x256xf32>
      tpu.vector_store %arg16[%15, %c0_8, %c0_9], %18 {strides = array<i32>} : memref<2x4x256xf32, #tpu.memory_space<vmem>>, vector<1x4x256xf32>,
      %c0_10 = arith.constant 0 : index
      %c0_11 = arith.constant 0 : index
      %19 = vector.load %arg7[%c0_10, %c0_11] : memref<4x1xf32, #tpu.memory_space<vmem>>, vector<4x1xf32>
      %20 = vector.broadcast %19 : vector<4x1xf32> to vector<4x256xf32>
      %21 = arith.subf %12, %20 : vector<4x256xf32>
      %c0_12 = arith.constant 0 : index
      %c0_13 = arith.constant 0 : index
      %22 = vector.load %arg12[%c0_12, %c0_13] : memref<4x128xf32, #tpu.memory_space<vmem>>, vector<4x128xf32>
      %c0_14 = arith.constant 0 : index
      %c0_15 = arith.constant 0 : index
      %23 = vector.load %arg13[%c0_14, %c0_15] : memref<4x128xf32, #tpu.memory_space<vmem>>, vector<4x128xf32>
      %24 = vector.extract_strided_slice %21 {offsets = [0, 0], sizes = [4, 128], strides = [1, 1]} : vector<4x256xf32> to vector<4x128xf32>
      %25 = arith.addf %22, %24 : vector<4x128xf32>
      %26 = arith.mulf %24, %24 : vector<4x128xf32>
      %27 = arith.addf %23, %26 : vector<4x128xf32>
      %28 = vector.extract_strided_slice %21 {offsets = [0, 128], sizes = [4, 128], strides = [1, 1]} : vector<4x256xf32> to vector<4x128xf32>
      %29 = arith.addf %25, %28 : vector<4x128xf32>
      %30 = arith.mulf %28, %28 : vector<4x128xf32>
      %31 = arith.addf %27, %30 : vector<4x128xf32>
      %c0_16 = arith.constant 0 : index
      %c0_17 = arith.constant 0 : index
      %32 = vector.load %arg12[%c0_16, %c0_17] : memref<4x128xf32, #tpu.memory_space<vmem>>, vector<4x128xf32>
      tpu.vector_store %arg12[%c0_16, %c0_17], %29 {strides = array<i32>} : memref<4x128xf32, #tpu.memory_space<vmem>>, vector<4x128xf32>,
      %c0_18 = arith.constant 0 : index
      %c0_19 = arith.constant 0 : index
      %33 = vector.load %arg13[%c0_18, %c0_19] : memref<4x128xf32, #tpu.memory_space<vmem>>, vector<4x128xf32>
      tpu.vector_store %arg13[%c0_18, %c0_19], %31 {strides = array<i32>} : memref<4x128xf32, #tpu.memory_space<vmem>>, vector<4x128xf32>,
      %c1_i32_20 = arith.constant 1 : i32
      %34 = arith.cmpi eq, %arg2, %c1_i32_20 : i32
      %c0_i32_21 = arith.constant 0 : i32
      %35 = arith.cmpi eq, %arg3, %c0_i32_21 : i32
      %36 = arith.andi %34, %35 : i1
      %37 = arith.extui %36 : i1 to i32
      %c0_i32_22 = arith.constant 0 : i32
      %38 = arith.cmpi ne, %37, %c0_i32_22 : i32
      scf.if %38 {
        %c0_23 = arith.constant 0 : index
        %c0_24 = arith.constant 0 : index
        %39 = vector.load %arg12[%c0_23, %c0_24] : memref<4x128xf32, #tpu.memory_space<vmem>>, vector<4x128xf32>
        %cst = arith.constant dense<0.000000e+00> : vector<4xf32>
        %40 = vector.multi_reduction <add>, %39, %cst [1] : vector<4x128xf32> to vector<4xf32>
        %41 = vector.shape_cast %40 : vector<4xf32> to vector<4x1xf32>
        %c0_25 = arith.constant 0 : index
        %c0_26 = arith.constant 0 : index
        %42 = vector.load %arg13[%c0_25, %c0_26] : memref<4x128xf32, #tpu.memory_space<vmem>>, vector<4x128xf32>
        %cst_27 = arith.constant dense<0.000000e+00> : vector<4xf32>
        %43 = vector.multi_reduction <add>, %42, %cst_27 [1] : vector<4x128xf32> to vector<4xf32>
        %44 = vector.shape_cast %43 : vector<4xf32> to vector<4x1xf32>
        %cst_28 = arith.constant 5.120000e+02 : f32
        %45 = vector.broadcast %cst_28 : f32 to vector<4x1xf32>
        %46 = arith.divf %41, %45 : vector<4x1xf32>
        %c0_29 = arith.constant 0 : index
        %c0_30 = arith.constant 0 : index
        %47 = vector.load %arg7[%c0_29, %c0_30] : memref<4x1xf32, #tpu.memory_space<vmem>>, vector<4x1xf32>
        %48 = arith.addf %47, %46 : vector<4x1xf32>
        %cst_31 = arith.constant 5.120000e+02 : f32
        %49 = vector.broadcast %cst_31 : f32 to vector<4x1xf32>
        %50 = arith.mulf %49, %46 : vector<4x1xf32>
        %51 = arith.mulf %50, %46 : vector<4x1xf32>
        %52 = arith.subf %44, %51 : vector<4x1xf32>
        %cst_32 = arith.constant 5.120000e+02 : f32
        %cst_33 = arith.constant 1.000000e+00 : f32
        %53 = arith.subf %cst_32, %cst_33 : f32
        %54 = vector.broadcast %53 : f32 to vector<4x1xf32>
        %55 = arith.divf %52, %54 : vector<4x1xf32>
        %cst_34 = arith.constant 0.000000e+00 : f32
        %56 = vector.broadcast %cst_34 : f32 to vector<4x1xf32>
        %57 = arith.maximumf %55, %56 : vector<4x1xf32>
        %58 = math.sqrt %57 : vector<4x1xf32>
        %cst_35 = arith.constant 9.99999974E-6 : f32
        %59 = vector.broadcast %cst_35 : f32 to vector<4x1xf32>
        %60 = arith.addf %58, %59 : vector<4x1xf32>
        %61 = tpu.reciprocal %60 : vector<4x1xf32> -> vector<4x1xf32>
        %c0_36 = arith.constant 0 : index
        %c0_37 = arith.constant 0 : index
        %62 = vector.load %arg5[%c0_36, %c0_37] : memref<4x1xf32, #tpu.memory_space<vmem>>, vector<4x1xf32>
        %63 = arith.mulf %62, %61 : vector<4x1xf32>
        %c0_38 = arith.constant 0 : index
        %c0_39 = arith.constant 0 : index
        %64 = vector.load %arg14[%c0_38, %c0_39] : memref<4x1xf32, #tpu.memory_space<vmem>>, vector<4x1xf32>
        tpu.vector_store %arg14[%c0_38, %c0_39], %63 {strides = array<i32>} : memref<4x1xf32, #tpu.memory_space<vmem>>, vector<4x1xf32>,
        %c0_40 = arith.constant 0 : index
        %c0_41 = arith.constant 0 : index
        %65 = vector.load %arg6[%c0_40, %c0_41] : memref<4x1xf32, #tpu.memory_space<vmem>>, vector<4x1xf32>
        %66 = arith.mulf %48, %63 : vector<4x1xf32>
        %67 = arith.subf %65, %66 : vector<4x1xf32>
        %c0_42 = arith.constant 0 : index
        %c0_43 = arith.constant 0 : index
        %68 = vector.load %arg15[%c0_42, %c0_43] : memref<4x1xf32, #tpu.memory_space<vmem>>, vector<4x1xf32>
        tpu.vector_store %arg15[%c0_42, %c0_43], %67 {strides = array<i32>} : memref<4x1xf32, #tpu.memory_space<vmem>>, vector<4x1xf32>,
        %c0_44 = arith.constant 0 : index
        %c0_45 = arith.constant 0 : index
        %69 = vector.load %arg7[%c0_44, %c0_45] : memref<4x1xf32, #tpu.memory_space<vmem>>, vector<4x1xf32>
        %cst_46 = arith.constant 0.899999976 : f32
        %70 = vector.broadcast %cst_46 : f32 to vector<4x1xf32>
        %71 = arith.mulf %70, %69 : vector<4x1xf32>
        %cst_47 = arith.constant 1.000000e-01 : f32
        %72 = vector.broadcast %cst_47 : f32 to vector<4x1xf32>
        %73 = arith.mulf %72, %48 : vector<4x1xf32>
        %74 = arith.addf %71, %73 : vector<4x1xf32>
        %c0_48 = arith.constant 0 : index
        %c0_49 = arith.constant 0 : index
        %75 = vector.load %arg10[%c0_48, %c0_49] : memref<4x1xf32, #tpu.memory_space<vmem>>, vector<4x1xf32>
        tpu.vector_store %arg10[%c0_48, %c0_49], %74 {strides = array<i32>} : memref<4x1xf32, #tpu.memory_space<vmem>>, vector<4x1xf32>,
        %c0_50 = arith.constant 0 : index
        %c0_51 = arith.constant 0 : index
        %76 = vector.load %arg8[%c0_50, %c0_51] : memref<4x1xf32, #tpu.memory_space<vmem>>, vector<4x1xf32>
        %cst_52 = arith.constant 0.899999976 : f32
        %77 = vector.broadcast %cst_52 : f32 to vector<4x1xf32>
        %78 = arith.mulf %77, %76 : vector<4x1xf32>
        %cst_53 = arith.constant 1.000000e-01 : f32
        %79 = vector.broadcast %cst_53 : f32 to vector<4x1xf32>
        %80 = arith.mulf %79, %57 : vector<4x1xf32>
        %81 = arith.addf %78, %80 : vector<4x1xf32>
        %c0_54 = arith.constant 0 : index
        %c0_55 = arith.constant 0 : index
        %82 = vector.load %arg11[%c0_54, %c0_55] : memref<4x1xf32, #tpu.memory_space<vmem>>, vector<4x1xf32>
        tpu.vector_store %arg11[%c0_54, %c0_55], %81 {strides = array<i32>} : memref<4x1xf32, #tpu.memory_space<vmem>>, vector<4x1xf32>,
      } else {
      }
    } else {
    }
    %c1_i32 = arith.constant 1 : i32
    %3 = arith.cmpi eq, %arg1, %c1_i32 : i32
    %4 = arith.extui %3 : i1 to i32
    %c0_i32_1 = arith.constant 0 : i32
    %5 = arith.cmpi ne, %4, %c0_i32_1 : i32
    scf.if %5 {
      %c1_i32_2 = arith.constant 1 : i32
      %6 = arith.muli %arg2, %c1_i32_2 : i32
      %7 = arith.addi %6, %arg3 : i32
      %8 = arith.index_cast %7 : i32 to index
      %c0 = arith.constant 0 : index
      %c0_3 = arith.constant 0 : index
      %9 = vector.load %arg16[%8, %c0, %c0_3] : memref<2x4x256xf32, #tpu.memory_space<vmem>>, vector<1x4x256xf32>
      %10 = vector.shape_cast %9 : vector<1x4x256xf32> to vector<4x256xf32>
      %c0_4 = arith.constant 0 : index
      %c0_5 = arith.constant 0 : index
      %11 = vector.load %arg14[%c0_4, %c0_5] : memref<4x1xf32, #tpu.memory_space<vmem>>, vector<4x1xf32>
      %12 = vector.broadcast %11 : vector<4x1xf32> to vector<4x256xf32>
      %13 = arith.mulf %10, %12 : vector<4x256xf32>
      %c0_6 = arith.constant 0 : index
      %c0_7 = arith.constant 0 : index
      %14 = vector.load %arg15[%c0_6, %c0_7] : memref<4x1xf32, #tpu.memory_space<vmem>>, vector<4x1xf32>
      %15 = vector.broadcast %14 : vector<4x1xf32> to vector<4x256xf32>
      %16 = arith.addf %13, %15 : vector<4x256xf32>
      %c0_8 = arith.constant 0 : index
      %c0_9 = arith.constant 0 : index
      %c0_10 = arith.constant 0 : index
      %17 = vector.load %arg9[%c0_8, %c0_9, %c0_10] : memref<1x4x256xf32, #tpu.memory_space<vmem>>, vector<1x4x256xf32>
      %18 = vector.shape_cast %17 : vector<1x4x256xf32> to vector<4x256xf32>
      %19 = vector.shape_cast %16 : vector<4x256xf32> to vector<1x4x256xf32>
      tpu.vector_store %arg9[%c0_8, %c0_9, %c0_10], %19 {strides = array<i32>} : memref<1x4x256xf32, #tpu.memory_space<vmem>>, vector<1x4x256xf32>,
    } else {
    }
    return
  }
  func.func @transform_0(%arg0: i32, %arg1: i32, %arg2: i32, %arg3: i32) -> (i32, i32, i32) {
    %c1_i32 = arith.constant 1 : i32
    %0 = arith.subi %c1_i32, %arg1 : i32
    %1 = arith.muli %arg2, %0 : i32
    %c1_i32_0 = arith.constant 1 : i32
    %2 = arith.muli %c1_i32_0, %arg1 : i32
    %3 = arith.addi %1, %2 : i32
    %4 = arith.muli %arg3, %0 : i32
    %c0_i32 = arith.constant 0 : i32
    %5 = arith.muli %c0_i32, %arg1 : i32
    %6 = arith.addi %4, %5 : i32
    %c0_i32_1 = arith.constant 0 : i32
    return %3, %arg0, %6 : i32, i32, i32
  }
  func.func @transform_1(%arg0: i32, %arg1: i32, %arg2: i32, %arg3: i32) -> (i32, i32) {
    %c0_i32 = arith.constant 0 : i32
    %c0_i32_0 = arith.constant 0 : i32
    return %arg0, %c0_i32 : i32, i32
  }
  func.func @transform_2(%arg0: i32, %arg1: i32, %arg2: i32, %arg3: i32) -> (i32, i32) {
    %c0_i32 = arith.constant 0 : i32
    %c0_i32_0 = arith.constant 0 : i32
    return %arg0, %c0_i32 : i32, i32
  }
  func.func @transform_3(%arg0: i32, %arg1: i32, %arg2: i32, %arg3: i32) -> (i32, i32) {
    %c0_i32 = arith.constant 0 : i32
    %c0_i32_0 = arith.constant 0 : i32
    return %arg0, %c0_i32 : i32, i32
  }
  func.func @transform_4(%arg0: i32, %arg1: i32, %arg2: i32, %arg3: i32) -> (i32, i32) {
    %c0_i32 = arith.constant 0 : i32
    %c0_i32_0 = arith.constant 0 : i32
    return %arg0, %c0_i32 : i32, i32
  }
  func.func @transform_5(%arg0: i32, %arg1: i32, %arg2: i32, %arg3: i32) -> (i32, i32, i32) {
    %0 = arith.muli %arg2, %arg1 : i32
    %1 = arith.muli %arg3, %arg1 : i32
    %c0_i32 = arith.constant 0 : i32
    return %0, %arg0, %1 : i32, i32, i32
  }
  func.func @transform_6(%arg0: i32, %arg1: i32, %arg2: i32, %arg3: i32) -> (i32, i32) {
    %c0_i32 = arith.constant 0 : i32
    %c0_i32_0 = arith.constant 0 : i32
    return %arg0, %c0_i32 : i32, i32
  }
  func.func @transform_7(%arg0: i32, %arg1: i32, %arg2: i32, %arg3: i32) -> (i32, i32) {
    %c0_i32 = arith.constant 0 : i32
    %c0_i32_0 = arith.constant 0 : i32
    return %arg0, %c0_i32 : i32, i32
  }
}

</mosaic_0001>

<bundles_post_ra>
// kernel: tpu_custom_call.1
= control target key start
LH: loop header
LB: loop body
LE: loop exit
PB: predicated region body
PF: predicated region fallthrough
CT: control target
= control target key end

     0   :  { %s1258_s0 = inlined_call_operand.vmem [shape: f32[2,4,256], index: 0, kind: input, shape index: {}]   ;;  %s1259_s1 = inlined_call_operand.vmem [shape: f32[4,1], index: 1, kind: input, shape index: {}]   ;;  %s1260_s2 = inlined_call_operand.vmem [shape: f32[4,1], index: 2, kind: input, shape index: {}]   ;;  %s1261_s3 = inlined_call_operand.vmem [shape: f32[4,1], index: 3, kind: input, shape index: {}]   ;;  %s1262_s4 = inlined_call_operand.vmem [shape: f32[4,1], index: 4, kind: input, shape index: {}]   ;;  %s1263_s5 = inlined_call_operand.hbm [shape: f32[2,4,256], index: 5, kind: output, shape index: {0}]   ;;  %s1264_s6 = inlined_call_operand.vmem [shape: f32[4,1], index: 6, kind: output, shape index: {1}]   ;;  %s1265_s7 = inlined_call_operand.vmem [shape: f32[4,1], index: 7, kind: output, shape index: {2}]  }
   0x1   :  { %1266 = sst [smem:[#allocation10_spill]] %s1258_s0 }
   0x2   :  { %1267 = sst [smem:[#allocation11_spill]] %s1259_s1 }
   0x3   :  { %1268 = sst [smem:[#allocation12_spill]] %s1260_s2 }
   0x4   :  { %1269 = sst [smem:[#allocation13_spill]] %s1261_s3 }
   0x5   :  { %13 = vsyncpa [#allocation8], 0 }
   0x6   :  { %15 = vsyncpa [#allocation8 + $0x1], 0  ;;  %s1088_s24 = smov 0   ;;  %s1090_s25 = smov 0  }
   0x7   :  { %s1092_s26 = smov 0   ;;  %s1094_s27 = smov 0  }
   0x8   :  { %s1096_s28 = smov 0   ;;  %s1098_s29 = smov 0  }
   0x9   :  { %s1100_s30 = smov 0   ;;  %s1102_s8 = smov 0  }
   0xa LB: > { %s833_s9 = sadd.s32 4294967295, %s1040_s8   ;;  %s834_s10 = sadd.s32 4294967294, %s1040_s8   ;;  %s1040_s8 = sphi %s1102_s8, %s21_s8   ;;  %s1036_s30 = sphi %s1100_s30, %s1283_s30   ;;  %s1032_s29 = sphi %s1098_s29, %s1282_s29   ;;  %s1028_s28 = sphi %s1096_s28, %s1281_s28   ;;  %s1024_s27 = sphi %s1094_s27, %s1280_s27   ;;  %s1020_s26 = sphi %s1092_s26, %s1279_s26   ;;  %s1016_s25 = sphi %s1090_s25, %s1278_s25   ;;  %s1012_s24 = sphi %s1088_s24, %s1277_s24  }
   0xb   : > { %s39_s11 = sadd.s32 1, %s1032_s29  ;;  %s43_s12 = sadd.s32 1, %s1036_s30 }
   0xc   : > { %p41_p0 = scmp.ge.s32.totalorder %s39_s11, 2  ;;  %s193_s13 = smul.u32 %s1032_s29, %s1036_s30 }
   0xd   : > { %p214_p1 = scmp.ne.s32.totalorder %s1020_s26, %s1016_s25  ;;  %p215_p2 = scmp.eq.s32.totalorder %s833_s9, 3 }
   0xe   : > { %s1285_s11 = smov (%p41_p0, %s39_s11), 0  ;;  %s1287_s12 = smov (!%p41_p0, %s43_s12), %s1036_s30 }
   0xf   : > { %p220_p3 = scmp.ne.s32.totalorder %s1016_s25, %s1012_s24  ;;  %p45_p4 = scmp.ge.s32.totalorder %s1287_s12, 2 }
  0x10   : > { %p221_p5 = scmp.eq.s32.totalorder %s834_s10, 3  ;;  %p1141_p6 = por %p215_p2, %p214_p1 }
  0x11   : > { %p841_p7 = scmp.ge.s32.totalorder %s1040_s8, 1  ;;  %s1289_s12 = smov (%p45_p4, %s1287_s12), 0 }
  0x12   : > { %p1148_p8 = por %p221_p5, %p220_p3  ;;  %p344_p9 = scmp.lt.s32.totalorder %s1040_s8, 5 }
  0x13   : > { %s195_s16 = smul.u32 %s1289_s12, %s1285_s11  ;;  %s204_s18 = sadd.s32 1, %s1020_s26 }
  0x14   : > { %p345_p10 = pnand %p841_p7, %p344_p9 }
  0x15   : > { %s197_s17 = ssub.s32 %s193_s13, %s195_s16  ;;  %s397_s20 = sand.u32 (!%p345_p10), 1, %s1016_s25  }
  0x16   : > { %p202_p11 = scmp.eq.s32.totalorder %s197_s17, 0  ;;  %348 = sbr.rel (%p345_p10) target bundleno = 543 (0x21f), region = 40 }
  0x17   : > { %s412_s21 = ssub.s32 (!%p345_p10), 1, %s1028_s28  ;;  %s1163_s22 = sshll.u32 (!%p345_p10), %s397_s20, 3 }
  0x18   : > { %s1157_s19 = scalar_select %p202_p11, %s1020_s26, %s204_s18  }
  0x19   : > { %s413_s23 = smul.u32 (!%p345_p10), %s1024_s27, %s412_s21  ;;  %s1272_s0 = sld [smem:[#allocation10_spill]] (!%p345_p10) }
  0x1a   : > { %s399_s18 = scalar_lea.vmem (!%p345_p10), [#allocation7], %s1163_s22  ;;  %p845_p13 = scmp.ne.s32.totalorder (!%p345_p10), %s1028_s28, 0 }
  0x1b   : > { %s414_s9 = sadd.s32 %s1028_s28, %s413_s23  ;;  %p465_p0 = scmp.eq.s32.totalorder (!%p845_p13), %s1024_s27, 0 }
  0x1c   : > { %p417_p12 = scmp.lt.s32.totalorder %s414_s9, 1  ;;  %464 = sbr.rel (%p845_p13) target bundleno = 377 (0x179), region = 44 }
  0x1e   : > { %s1291_s9 = smov (!%p417_p12, %s414_s9), 1 }
  0x1f   : > { %s860_s10 = sshll.u32 %s1291_s9, 3 }
  0x20   : > { %s428_s17 = scalar_lea.vmem %s1272_s0, %s860_s10 }
  0x21   : > { %470 = sbr.rel (!%p465_p0) target bundleno = 38 (0x26), region = 48  ;;  %v1042_v0 = vmov (%p465_p0), 0.0  }
  0x22   : > { %471 = vst [vmem:[#allocation2] sm:$0xf] (%p465_p0), %v1042_v0  ;;  %472 = vst [vmem:[#allocation3] sm:$0xf] (%p465_p0), %v1042_v0 }
  0x26 PF: > { %s1273_s3 = sld [smem:[#allocation13_spill]]  ;;  %v1043_v2 = vmov 0   ;;  %s862_s9 = sshll.u32 %s1024_s27, 3  ;;  %v473_v3 = vld [vmem:[%s428_s17] sm:$0xff]  ;;  %v1044_v4 = vmov 839922192   ;;  %v487_v6 = vlaneseq }
  0x27   : > { %942 = vset.pattern.permute.xlu0 %v1043_v2  ;;  %s477_s10 = scalar_lea.vmem [#allocation6], %s862_s9  ;;  %p508_p1 = scmp.eq.s32.totalorder %s1024_s27, 1  ;;  %v485_v5 = vunpack.c.l.s4 %v1044_v4 }
  0x28   : > { %478 = vst [vmem:[%s477_s10] sm:$0xff] %v473_v3  ;;  %v488_v8 = vshrl.u32 %v487_v6, 7  ;;  %vm514_vm0 = vcmask (%p508_p1), 1043456   ;;  %vm543_vm1 = vcmask (%p508_p1), 3072   ;;  %v554_v39 = vld [vmem:[%s1262_s4] sm:$0xf] (%p508_p1)  ;;  %s1275_s1 = sld [smem:[#allocation11_spill]] (%p508_p1) }
  0x29   : > { %v486_v7 = vunpack.c.0.s8 %v485_v5  ;;  %v493_v12 = vld [vmem:[#allocation2] sm:$0xf]  ;;  %v494_v14 = vld [vmem:[#allocation3] sm:$0xf]  ;;  %v555_v42 = vmul.f32 (%p508_p1), 0.9, %v554_v39 }
  0x2a   : > { %s1276_s2 = sld [smem:[#allocation12_spill]] (%p508_p1) }
  0x2b   : > { %v489_v9 = vsub.s32 %v486_v7, %v488_v8 }
  0x2c   : > { %v479_v1 = vld [vmem:[%s1273_s3] sm:$0xf]  ;;  %s1274_s3 = sld [smem:[#allocation13_spill]] (%p508_p1) }
  0x2d   : > { %482 = vperm.xlu0 %942, %v479_v1  }
  0x2e   : > { %v541_v51 = vld [vmem:[%s1275_s1] sm:$0xf] (%p508_p1) }
  0x30   : > { %v545_v54 = vld [vmem:[%s1276_s2] sm:$0xf] (%p508_p1) }
  0x32   : > { %v524_v27 = vld [vmem:[%s1274_s3] sm:$0xf] (%p508_p1) }
  0x33   : > { %v549_v28 = vld [vmem:[%s1274_s3] sm:$0xf] (%p508_p1) }
  0x34   : > { %v550_v31 = vmul.f32 (%p508_p1), 0.9, %v549_v28 }
  0xa8   : > { %v483_v10 = vpop.permute.xlu0 %482 }
  0xa9   : > { %v490_v11 = vrot.slane %v483_v10, %v489_v9 }
  0xab   : > { %v492_v13 = vsub.f32 %v473_v3, %v490_v11 }
  0xad   : > { %v495_v15 = vadd.f32 %v493_v12, %v492_v13  ;;  %v496_v16 = vmul.f32 %v492_v13, %v492_v13  ;;  %v499_v17 = vcombine.high %v492_v13, %v492_v13  ;;  %v502_v18 = vrot.slane %v492_v13, 4 }
  0xaf   : > { %v497_v19 = vadd.f32 %v496_v16, %v494_v14  ;;  %v501_v20 = vadd.f32 %v499_v17, %v495_v15  ;;  %v504_v21 = vmul.f32 %v502_v18, %v502_v18  ;;  %512 = sbr.rel (!%p508_p1) target bundleno = 377 (0x179), region = 52 }
  0xb1   : > { %v505_v22 = vadd.f32 %v504_v21, %v497_v19  ;;  %506 = vst [vmem:[#allocation2] sm:$0xf] %v501_v20 }
  0xb3   : > { %507 = vst [vmem:[#allocation3] sm:$0xf] %v505_v22 }
  0xb8   : > { %v513_v23 = vld [vmem:[#allocation2] sm:$0xf] }
  0xb9   : > { %v515_v25 = vsel %vm514_vm0, %v513_v23, 0.0 }
  0xba   : > { %v518_v24 = vld [vmem:[#allocation3] sm:$0xf]  ;;  %516 = vadd.xlane.f32.xlu0 %v515_v25 }
  0xbb   : > { %v519_v26 = vsel %vm514_vm0, %v518_v24, 0.0 }
  0xbe   : > { %520 = vadd.xlane.f32.xlu0 %v519_v26 }
 0x143   : > { %v517_v29 = vpop.xlane.xlu0 %516 }
 0x144   : > { %v523_v30 = vmul.f32 0.001953125, %v517_v29 }
 0x146   : > { %v525_v32 = vadd.f32 %v524_v27, %v523_v30  ;;  %v526_v33 = vmul.f32 512.0, %v523_v30 }
 0x147   : > { %v521_v34 = vpop.xlane.xlu0 %520 }
 0x148   : > { %v551_v35 = vmul.f32 0.1, %v525_v32  ;;  %v527_v36 = vmul.f32 %v526_v33, %v523_v30 }
 0x14a   : > { %v552_v37 = vadd.f32 %v551_v35, %v550_v31  ;;  %v528_v38 = vsub.f32 %v521_v34, %v527_v36 }
 0x14c   : > { %553 = vst.msk [vmem:[%s1264_s6] sm:$0xf] %vm543_vm1, %v552_v37  ;;  %v530_v40 = vmul.f32 0.0019569471, %v528_v38 }
 0x14e   : > { %v531_v41 = vmax.f32 %v530_v40, 0.0 }
 0x150   : > { %943 = vrsqrt.f32 %v531_v41  ;;  %v556_v43 = vmul.f32 0.1, %v531_v41  ;;  %vm534_vm2 = vcmp.eq.f32.partialorder %v531_v41, inf  ;;  %v537_v47 = vand.u32 2147483648, %v531_v41 }
 0x151   : > { %vm536_vm3 = vcmp.eq.f32.partialorder %v531_v41, 0.0 }
 0x152   : > { %v557_v44 = vadd.f32 %v556_v43, %v555_v42 }
 0x154   : > { %558 = vst.msk [vmem:[%s1265_s7] sm:$0xf] %vm543_vm1, %v557_v44 }
 0x15d   : > { %v944_v45 = vpop.eup %943 }
 0x15e   : > { %v533_v46 = vmul.f32 %v944_v45, %v531_v41 }
 0x160   : > { %v535_v48 = vsel %vm534_vm2, %v531_v41, %v533_v46 }
 0x161   : > { %v538_v49 = vsel %vm536_vm3, %v537_v47, %v535_v48 }
 0x162   : > { %v539_v50 = vadd.f32 1e-05, %v538_v49 }
 0x164   : > { %945 = vrcp.f32 %v539_v50 }
 0x171   : > { %v946_v52 = vpop.eup %945 }
 0x172   : > { %v542_v53 = vmul.f32 %v946_v52, %v541_v51 }
 0x174   : > { %544 = vst.msk [vmem:[#allocation4] sm:$0xf] %vm543_vm1, %v542_v53  ;;  %v546_v55 = vmul.f32 %v542_v53, %v525_v32 }
 0x176   : > { %v547_v56 = vsub.f32 %v545_v54, %v546_v55 }
 0x178   : > { %548 = vst.msk [vmem:[#allocation5] sm:$0xf] %vm543_vm1, %v547_v56 }
 0x179 PF: > { %p850_p2 = scmp.ne.s32.totalorder %s1028_s28, 1 }
 0x17a   : > { %s864_s13 = sshll.u32 (!%p850_p2), %s1024_s27, 3 }
 0x17b   : > { %562 = sbr.rel (%p850_p2) target bundleno = 519 (0x207), region = 56  ;;  %s566_s16 = scalar_lea.vmem (!%p850_p2), [#allocation6], %s864_s13 }
 0x180   : > { %v568_v57 = vld [vmem:[#allocation4] sm:$0xf]  ;;  %v1045_v58 = vmov 0   ;;  %v582_v59 = vld [vmem:[#allocation5] sm:$0xf]  ;;  %v576_v62 = vlaneseq  ;;  %v567_v4 = vld [vmem:[%s566_s16] sm:$0xff] }
 0x181   : > { %947 = vset.pattern.permute.xlu0 %v1045_v58  ;;  %v1046_v60 = vmov 839922192  }
 0x182   : > { %571 = vperm.xlu0 %947, %v568_v57   ;;  %v574_v61 = vunpack.c.l.s4 %v1046_v60  ;;  %v577_v0 = vshrl.u32 %v576_v62, 7 }
 0x184   : > { %v575_v63 = vunpack.c.0.s8 %v574_v61 }
 0x186   : > { %585 = vperm.xlu0 %947, %v582_v59   ;;  %v578_v1 = vsub.s32 %v575_v63, %v577_v0 }
 0x1fd   : > { %v572_v2 = vpop.permute.xlu0 %571 }
 0x1fe   : > { %v579_v3 = vrot.slane %v572_v2, %v578_v1 }
 0x200   : > { %v581_v6 = vmul.f32 %v579_v3, %v567_v4 }
 0x201   : > { %v586_v5 = vpop.permute.xlu0 %585 }
 0x202   : > { %v593_v7 = vrot.slane %v586_v5, %v578_v1 }
 0x204   : > { %v595_v8 = vadd.f32 %v593_v7, %v581_v6 }
 0x206   : > { %596 = vst [vmem:[%s399_s18] sm:$0xff] %v595_v8 }
 0x207 PF: > { %s613_s17 = smul.u32 %s1024_s27, %s1028_s28  ;;  %s626_s21 = sshll.u32 %s399_s18, 4  ;;  %s627_s21 = int_to_ptr.vmem [resolvable:$true] %s626_s21 }
 0x208   : > { %s598_s16 = scalar_lea.sflag [#allocation8], %s397_s20  ;;  %s948_s0 = scalar_lea.vmem %s627_s21, 128 }
 0x209   : > { %s865_s23 = sshll.u32 %s613_s17, 7  ;;  %p949_p3 = scmp.ne.s32.totalorder %s627_s21, %s948_s0 }
 0x20a   : > { %s624_s13 = scalar_lea.hbm %s1263_s5, %s865_s23  ;;  %s1047_s1 = smov [#allocation7]  }
 0x20b   : > { %p950_p4 = pnand %p949_p3, %p1141_p6  ;;  %s952_s2 = sshll.u32 %s1047_s1, 4  ;;  %s953_s2 = int_to_ptr.vmem [resolvable:$false] %s952_s2 }
 0x20c   : > { %s954_s3 = scalar_lea.vmem %s953_s2, 256  ;;  %p955_p7 = scmp.lt.s32.totalorder %s627_s21, %s953_s2 }
 0x20d   : > { %p951_p5 = pneg %p950_p4  ;;  %p956_p9 = scmp.lt.s32.totalorder %s954_s3, %s948_s0 }
 0x20f   : > { %p957_p10 = por %p956_p9, %p955_p7 }
 0x211   : > { %p958_p11 = pnand %p957_p10, %p951_p5 }
 0x213   : > { %961 = shalt.err (!%p958_p11)
}
 0x214   : > { %s962_s27 = scalar_lea.hbm %s624_s13, 128  ;;  %s966_s22 = scalar_lea.hbm %s1263_s5, 256 }
 0x215   : > { %p963_p12 = scmp.ne.s32.totalorder %s624_s13, %s962_s27  ;;  %p967_p1 = scmp.lt.s32.totalorder %s624_s13, %s1263_s5 }
 0x216   : > { %p968_p2 = scmp.lt.s32.totalorder %s966_s22, %s962_s27 }
 0x217   : > { %p964_p13 = pnand %p963_p12, %p1141_p6 }
 0x218   : > { %p969_p3 = por %p968_p2, %p967_p1 }
 0x219   : > { %p965_p0 = pneg %p964_p13 }
 0x21b   : > { %p970_p4 = pnand %p969_p3, %p965_p0 }
 0x21d   : > { %973 = shalt.err (!%p970_p4)
}
 0x21e   : > { %866 = dma.vmem_to_hbm [thread:$0]  (%p1141_p6), %s627_s21, 128, %s624_s13, %s598_s16  }
 0x21f PF: > { %p872_p5 = scmp.ge.s32.totalorder %s1040_s8, 2  ;;  %s658_s0 = sand.u32 1, %s1012_s24  }
 0x220   : > { %s659_s1 = scalar_lea.sflag [#allocation8], %s658_s0 }
 0x221   : > { %p869_p7 = pnand %p872_p5, %p1148_p8 }
 0x223   : > { %p870_p9 = pneg %p869_p7 }
 0x225   : > { %1007 = dma.done.wait (%p870_p9), %s659_s1, 128  }
 0x226   : > { %1009 = vsyncadd (%p870_p9), %s659_s1, 4294967168  ;;  %s21_s8 = sadd.s32 1, %s1040_s8   ;;  %s1277_s24 = smov %s1016_s25 }
 0x227   : > { %p18_p10 = scmp.ge.s32.totalorder %s21_s8, 6   ;;  %s1278_s25 = smov %s1020_s26 }
 0x228   : > { %s1279_s26 = smov %s1157_s19  ;;  %s1280_s27 = smov %s1032_s29 }
 0x229   : > { %s1281_s28 = smov %s1036_s30  ;;  %s1282_s29 = smov %s1285_s11 }
 0x22a   : > { %s1283_s30 = smov %s1289_s12  ;;  %20 = sbr.rel (!%p18_p10) target bundleno = 10 (0xa), region = 129 }
 0x22f   :  { %664 = vsyncpa [#allocation8], 1 }
 0x230   :  { %666 = vsyncpa [#allocation8 + $0x1], 1 }

</bundles_post_ra>
